<compile_context>
chip_gen: v6e
topology: v6e:2x2x1
jax: 0.10.0
libtpu: 0.0.40
codegen_flags: <defaults>
</compile_context>

<pallas_src>
import jax
import jax.numpy as jnp
from jax.experimental import pallas as pl
from jax.experimental.pallas import tpu as pltpu

ESIZE = 768
CLASS_SIZE = 2
LANE = 128          # TPU lane width; padded logits width
ROW_TILE = 1024     # default row tile (multiple of 8); safe on v5e/v6e/v7x


def _linear_kernel(x_ref, w_ref, b_ref, o_ref):
    # One row-tile per grid step: (TB, E) @ (E, Cp) + (1, Cp) on the MXU, f32 accumulate.
    x = x_ref[...]                       # (TB, E)
    w = w_ref[...]                       # (E, Cp)   VMEM-resident across the grid
    b = b_ref[...]                       # (1, Cp)
    acc = jnp.dot(x, w, preferred_element_type=jnp.float32) + b
    o_ref[...] = acc.astype(o_ref.dtype)


def classification_head_forward(hidden_state, weight_t, bias, *, row_tile=ROW_TILE):
    """hidden_state: (..., E); weight_t: (E, C) = torch W.T; bias: (C,). Returns (..., C)."""
    lead_shape = hidden_state.shape[:-1]
    E = hidden_state.shape[-1]
    C = weight_t.shape[-1]

    x2d = hidden_state.reshape(-1, E)
    B = x2d.shape[0]

    # Lane-dense padded output width (unmasked stores, full-vreg bias add).
    Cp = max(LANE, ((C + LANE - 1) // LANE) * LANE)
    w_pad = jnp.zeros((E, Cp), weight_t.dtype).at[:, :C].set(weight_t)
    b_pad = jnp.zeros((1, Cp), bias.dtype).at[:, :C].set(bias)

    # Row tiling: multiple of 8, capped at row_tile; pad B up to a multiple of TB.
    TB = min(row_tile, ((B + 7) // 8) * 8)
    Bp = ((B + TB - 1) // TB) * TB
    if Bp != B:
        x2d = jnp.pad(x2d, ((0, Bp - B), (0, 0)))

    itemsize = jnp.dtype(x2d.dtype).itemsize
    cost = pl.CostEstimate(
        flops=2 * Bp * E * Cp,
        transcendentals=0,
        bytes_accessed=itemsize * Bp * E + 4 * E * Cp + itemsize * Bp * Cp,
    )

    out2d = pl.pallas_call(
        _linear_kernel,
        out_shape=jax.ShapeDtypeStruct((Bp, Cp), hidden_state.dtype),
        grid_spec=pltpu.PrefetchScalarGridSpec(
            num_scalar_prefetch=0,
            grid=(Bp // TB,),
            in_specs=[
                pl.BlockSpec((TB, E), lambda i: (i, 0)),   # x: tiled over rows
                pl.BlockSpec((E, Cp), lambda i: (0, 0)),   # weight: constant, stays in VMEM
                pl.BlockSpec((1, Cp), lambda i: (0, 0)),   # bias: constant
            ],
            out_specs=pl.BlockSpec((TB, Cp), lambda i: (i, 0)),
        ),
        compiler_params=pltpu.CompilerParams(
            dimension_semantics=("parallel",)),
        cost_estimate=cost,
    )(x2d, w_pad, b_pad)

    return out2d[:B, :C].reshape(*lead_shape, C)


def init_params(key, embed_size=ESIZE, class_size=CLASS_SIZE):
    # Deterministic init mimicking torch.nn.Linear default: U(-1/sqrt(E), 1/sqrt(E)).
    kw, kb = jax.random.split(key)
    bound = 1.0 / jnp.sqrt(jnp.float32(embed_size))
    # PyTorch stores weight as (class_size, embed_size); we keep its transpose (E, C)
    # so the kernel computes x @ W^T directly.
    weight = jax.random.uniform(kw, (class_size, embed_size), jnp.float32, -bound, bound)
    bias = jax.random.uniform(kb, (class_size,), jnp.float32, -bound, bound)
    return weight.T, bias


if __name__ == "__main__":
    key = jax.random.PRNGKey(0)
    k_x, k_p = jax.random.split(key)

    # Small example consistent with the module: (batch=2, seq=8, hidden=768)
    hidden_state = jax.random.normal(k_x, (2, 8, ESIZE), dtype=jnp.float32)
    weight_t, bias = init_params(k_p)

    logits = classification_head_forward(hidden_state, weight_t, bias)
    logits = jax.block_until_ready(logits)

    # Cross-check against plain JAX reference.
    ref = hidden_state @ weight_t + bias
    assert logits.shape == (2, 8, CLASS_SIZE)
    assert jnp.allclose(logits, ref, atol=1e-4, rtol=1e-4)

    print("KERNEL_OK")
</pallas_src>

<mosaic_0001>
module attributes {stable_mosaic.version = 11 : i64} {
  func.func @_linear_kernel(%arg0: i32, %arg1: memref<16x768xf32, #tpu.memory_space<vmem>>, %arg2: memref<768x128xf32, #tpu.memory_space<vmem>>, %arg3: memref<1x128xf32, #tpu.memory_space<vmem>>, %arg4: memref<16x128xf32, #tpu.memory_space<vmem>>) attributes {dimension_semantics = [#tpu.dimension_semantics<parallel>], iteration_bounds = array<i64: 1>, scalar_prefetch = 0 : i64, scratch_operands = 0 : i64, tpu.core_type = #tpu.core_type<tc>, window_params = [{transform_indices = @transform_0, window_bounds = array<i64: 16, 768>}, {pipeline_mode = #tpu.pipeline_mode<synchronous>, transform_indices = @transform_1, window_bounds = array<i64: 768, 128>}, {pipeline_mode = #tpu.pipeline_mode<synchronous>, transform_indices = @transform_2, window_bounds = array<i64: 1, 128>}, {transform_indices = @transform_3, window_bounds = array<i64: 16, 128>}]} {
    %c0 = arith.constant 0 : index
    %c0_0 = arith.constant 0 : index
    %0 = vector.load %arg1[%c0, %c0_0] : memref<16x768xf32, #tpu.memory_space<vmem>>, vector<16x768xf32>
    %c0_1 = arith.constant 0 : index
    %c0_2 = arith.constant 0 : index
    %1 = vector.load %arg2[%c0_1, %c0_2] : memref<768x128xf32, #tpu.memory_space<vmem>>, vector<768x128xf32>
    %c0_3 = arith.constant 0 : index
    %c0_4 = arith.constant 0 : index
    %2 = vector.load %arg3[%c0_3, %c0_4] : memref<1x128xf32, #tpu.memory_space<vmem>>, vector<1x128xf32>
    %cst = arith.constant dense<0.000000e+00> : vector<16x128xf32>
    %3 = tpu.matmul %0, %1, %cst {dimension_numbers = #tpu.dot_dimension_numbers<[1], [0], [0], [1], [0, 0, 1, 1], [], []>} : vector<16x768xf32>, vector<768x128xf32>, vector<16x128xf32> -> vector<16x128xf32>
    %4 = vector.broadcast %2 : vector<1x128xf32> to vector<16x128xf32>
    %5 = arith.addf %3, %4 : vector<16x128xf32>
    %c0_5 = arith.constant 0 : index
    %c0_6 = arith.constant 0 : index
    %6 = vector.load %arg4[%c0_5, %c0_6] : memref<16x128xf32, #tpu.memory_space<vmem>>, vector<16x128xf32>
    tpu.vector_store %arg4[%c0_5, %c0_6], %5 {strides = array<i32>} : memref<16x128xf32, #tpu.memory_space<vmem>>, vector<16x128xf32>,
    return
  }
  func.func @transform_0(%arg0: i32) -> (i32, i32) {
    %c0_i32 = arith.constant 0 : i32
    %c0_i32_0 = arith.constant 0 : i32
    return %arg0, %c0_i32 : i32, i32
  }
  func.func @transform_1(%arg0: i32) -> (i32, i32) {
    %c0_i32 = arith.constant 0 : i32
    %c0_i32_0 = arith.constant 0 : i32
    %c0_i32_1 = arith.constant 0 : i32
    return %c0_i32, %c0_i32_0 : i32, i32
  }
  func.func @transform_2(%arg0: i32) -> (i32, i32) {
    %c0_i32 = arith.constant 0 : i32
    %c0_i32_0 = arith.constant 0 : i32
    %c0_i32_1 = arith.constant 0 : i32
    return %c0_i32, %c0_i32_0 : i32, i32
  }
  func.func @transform_3(%arg0: i32) -> (i32, i32) {
    %c0_i32 = arith.constant 0 : i32
    %c0_i32_0 = arith.constant 0 : i32
    return %arg0, %c0_i32 : i32, i32
  }
}

</mosaic_0001>

<bundles_post_ra>
// kernel: tpu_custom_call.1
= control target key start
LH: loop header
LB: loop body
LE: loop exit
PB: predicated region body
PF: predicated region fallthrough
CT: control target
= control target key end

     0   :  { %8 = vsyncpa [#allocation3], 0  ;;  %s668_s0 = inlined_call_operand.hbm [shape: f32[16,768], index: 0, kind: input, shape index: {}]   ;;  %s669_s1 = inlined_call_operand.hbm [shape: f32[768,128], index: 1, kind: input, shape index: {}]   ;;  %s670_s2 = inlined_call_operand.vmem [shape: f32[1,128], index: 2, kind: input, shape index: {}]   ;;  %s671_s3 = inlined_call_operand.hbm [shape: f32[16,128], index: 3, kind: output, shape index: {}]  }
   0x1   :  { %9 = vsyncpa [#allocation6], 0 }
   0x2   :  { %10 = vsyncpa [#allocation4], 0  ;;  %s623_s12 = smov [#allocation2]  }
   0x3   :  { %s16_s13 = sshll.u32 %s623_s12, 4  ;;  %s17_s13 = int_to_ptr.vmem [resolvable:$true] %s16_s13 }
   0x4   :  { %s565_s14 = scalar_lea.vmem %s17_s13, 1536  ;;  %p570_p1 = scmp.lt.s32.totalorder %s17_s13, %s17_s13 }
   0x5   :  { %p566_p0 = scmp.ne.s32.totalorder %s17_s13, %s565_s14  ;;  %p571_p2 = scmp.lt.s32.totalorder %s565_s14, %s565_s14 }
   0x7   :  { %p572_p3 = por %p571_p2, %p570_p1 }
   0x9   :  { %p573_p4 = pnand %p572_p3, %p566_p0 }
   0xb   :  { %576 = shalt.err (!%p573_p4)
}
   0xc   :  { %s624_s15 = smov 768   ;;  %s625_s16 = smov 48  }
   0xd   :  { %22 = dma.hbm_to_vmem [thread:$0]  %s668_s0, 1536, %s17_s13, [#allocation3], %s624_s15, %s624_s15, %s625_s16  }
   0xe   :  { %s626_s19 = smov [#allocation5]  }
   0xf   :  { %s28_s20 = sshll.u32 %s626_s19, 4  ;;  %s29_s20 = int_to_ptr.vmem [resolvable:$true] %s28_s20 }
  0x10   :  { %s585_s21 = scalar_lea.vmem %s29_s20, 12288  ;;  %p590_p6 = scmp.lt.s32.totalorder %s29_s20, %s29_s20 }
  0x11   :  { %p586_p5 = scmp.ne.s32.totalorder %s29_s20, %s585_s21  ;;  %p591_p7 = scmp.lt.s32.totalorder %s585_s21, %s585_s21 }
  0x13   :  { %p592_p8 = por %p591_p7, %p590_p6 }
  0x15   :  { %p593_p9 = pnand %p592_p8, %p586_p5 }
  0x17   :  { %596 = shalt.err (!%p593_p9)
}
  0x18   :  { %s627_s22 = smov 128   ;;  %s628_s23 = smov 8  }
  0x19   :  { %34 = dma.hbm_to_vmem [thread:$0]  %s669_s1, 12288, %s29_s20, [#allocation6], %s627_s22, %s627_s22, %s628_s23  }
  0x1a   :  { %617 = dma.done.wait [#allocation3], 1536  }
  0x1b   :  { %618 = vsyncadd [#allocation3], 4294965760 }
  0x1c   :  { %619 = dma.done.wait [#allocation6], 12288  }
  0x1d   :  { %620 = vsyncadd [#allocation6], 4294955008  ;;  %v86_v0 = vld [vmem:[#allocation5 + $0xf8] sm:$0xff]  ;;  %v85_v4 = vld [vmem:[#allocation5 + $0xf0] sm:$0xff]  ;;  %s629_s26 = smov [#allocation7]  }
  0x1e   :  { %v118_v1 = vld [vmem:[#allocation5 + $0x1f8] sm:$0xff]  ;;  %404 = vmatprep.subr.mxu0 %v86_v0  ;;  %v117_v5 = vld [vmem:[#allocation5 + $0x1f0] sm:$0xff]  ;;  %v84_v8 = vld [vmem:[#allocation5 + $0xe8] sm:$0xff]  ;;  %s390_s27 = sshll.u32 %s629_s26, 4  ;;  %s391_s27 = int_to_ptr.vmem [resolvable:$true] %s390_s27 }
  0x1f   :  { %v70_v2 = vld [vmem:[#allocation5 + $0x78] sm:$0xff]  ;;  %442 = vmatprep.subr.mxu1 %v118_v1  ;;  %v69_v6 = vld [vmem:[#allocation5 + $0x70] sm:$0xff]  ;;  %v116_v9 = vld [vmem:[#allocation5 + $0x1e8] sm:$0xff]  ;;  %p602_p11 = scmp.lt.s32.totalorder %s391_s27, %s391_s27 }
  0x20   :  { %v102_v3 = vld [vmem:[#allocation5 + $0x178] sm:$0xff]  ;;  %405 = vmatpush3.msra.mxu0 %v70_v2  ;;  %v101_v7 = vld [vmem:[#allocation5 + $0x170] sm:$0xff]  ;;  %v68_v10 = vld [vmem:[#allocation5 + $0x68] sm:$0xff] }
  0x21   :  { %443 = vmatpush3.msra.mxu1 %v102_v3  ;;  %406 = vmatprep.subr.mxu0 %v85_v4  ;;  %v100_v11 = vld [vmem:[#allocation5 + $0x168] sm:$0xff]  ;;  %v83_v12 = vld [vmem:[#allocation5 + $0xe0] sm:$0xff]  ;;  %v82_v16 = vld [vmem:[#allocation5 + $0xd8] sm:$0xff] }
  0x22   :  { %444 = vmatprep.subr.mxu1 %v117_v5  ;;  %407 = vmatpush3.msra.mxu0 %v69_v6  ;;  %v115_v13 = vld [vmem:[#allocation5 + $0x1e0] sm:$0xff]  ;;  %v114_v17 = vld [vmem:[#allocation5 + $0x1d8] sm:$0xff]  ;;  %v81_v20 = vld [vmem:[#allocation5 + $0xd0] sm:$0xff] }
  0x23   :  { %445 = vmatpush3.msra.mxu1 %v101_v7  ;;  %408 = vmatprep.subr.mxu0 %v84_v8  ;;  %v67_v14 = vld [vmem:[#allocation5 + $0x60] sm:$0xff]  ;;  %v66_v18 = vld [vmem:[#allocation5 + $0x58] sm:$0xff]  ;;  %v113_v21 = vld [vmem:[#allocation5 + $0x1d0] sm:$0xff] }
  0x24   :  { %446 = vmatprep.subr.mxu1 %v116_v9  ;;  %v99_v15 = vld [vmem:[#allocation5 + $0x160] sm:$0xff]  ;;  %409 = vmatpush3.msra.mxu0 %v68_v10  ;;  %v98_v19 = vld [vmem:[#allocation5 + $0x158] sm:$0xff]  ;;  %v65_v22 = vld [vmem:[#allocation5 + $0x50] sm:$0xff] }
  0x25   :  { %447 = vmatpush3.msra.mxu1 %v100_v11  ;;  %410 = vmatprep.subr.mxu0 %v83_v12  ;;  %v97_v23 = vld [vmem:[#allocation5 + $0x150] sm:$0xff]  ;;  %v80_v24 = vld [vmem:[#allocation5 + $0xc8] sm:$0xff]  ;;  %v79_v28 = vld [vmem:[#allocation5 + $0xc0] sm:$0xff] }
  0x26   :  { %448 = vmatprep.subr.mxu1 %v115_v13  ;;  %411 = vmatpush3.msra.mxu0 %v67_v14  ;;  %v112_v25 = vld [vmem:[#allocation5 + $0x1c8] sm:$0xff]  ;;  %v111_v29 = vld [vmem:[#allocation5 + $0x1c0] sm:$0xff]  ;;  %v78_v32 = vld [vmem:[#allocation5 + $0xb8] sm:$0xff] }
  0x27   :  { %449 = vmatpush3.msra.mxu1 %v99_v15  ;;  %412 = vmatprep.subr.mxu0 %v82_v16  ;;  %v64_v26 = vld [vmem:[#allocation5 + $0x48] sm:$0xff]  ;;  %v63_v30 = vld [vmem:[#allocation5 + $0x40] sm:$0xff]  ;;  %v110_v33 = vld [vmem:[#allocation5 + $0x1b8] sm:$0xff] }
  0x28   :  { %450 = vmatprep.subr.mxu1 %v114_v17  ;;  %413 = vmatpush3.msra.mxu0 %v66_v18  ;;  %v96_v27 = vld [vmem:[#allocation5 + $0x148] sm:$0xff]  ;;  %v95_v31 = vld [vmem:[#allocation5 + $0x140] sm:$0xff]  ;;  %v62_v34 = vld [vmem:[#allocation5 + $0x38] sm:$0xff] }
  0x29   :  { %451 = vmatpush3.msra.mxu1 %v98_v19  ;;  %414 = vmatprep.subr.mxu0 %v81_v20  ;;  %v94_v35 = vld [vmem:[#allocation5 + $0x138] sm:$0xff]  ;;  %v77_v36 = vld [vmem:[#allocation5 + $0xb0] sm:$0xff]  ;;  %v76_v40 = vld [vmem:[#allocation5 + $0xa8] sm:$0xff] }
  0x2a   :  { %452 = vmatprep.subr.mxu1 %v113_v21  ;;  %415 = vmatpush3.msra.mxu0 %v65_v22  ;;  %v109_v37 = vld [vmem:[#allocation5 + $0x1b0] sm:$0xff]  ;;  %v108_v41 = vld [vmem:[#allocation5 + $0x1a8] sm:$0xff]  ;;  %v75_v44 = vld [vmem:[#allocation5 + $0xa0] sm:$0xff] }
  0x2b   :  { %453 = vmatpush3.msra.mxu1 %v97_v23  ;;  %416 = vmatprep.subr.mxu0 %v80_v24  ;;  %v61_v38 = vld [vmem:[#allocation5 + $0x30] sm:$0xff]  ;;  %v60_v42 = vld [vmem:[#allocation5 + $0x28] sm:$0xff]  ;;  %v107_v45 = vld [vmem:[#allocation5 + $0x1a0] sm:$0xff] }
  0x2c   :  { %454 = vmatprep.subr.mxu1 %v112_v25  ;;  %417 = vmatpush3.msra.mxu0 %v64_v26  ;;  %v93_v39 = vld [vmem:[#allocation5 + $0x130] sm:$0xff]  ;;  %v92_v43 = vld [vmem:[#allocation5 + $0x128] sm:$0xff]  ;;  %v59_v46 = vld [vmem:[#allocation5 + $0x20] sm:$0xff] }
  0x2d   :  { %455 = vmatpush3.msra.mxu1 %v96_v27  ;;  %418 = vmatprep.subr.mxu0 %v79_v28  ;;  %v91_v47 = vld [vmem:[#allocation5 + $0x120] sm:$0xff]  ;;  %v74_v48 = vld [vmem:[#allocation5 + $0x98] sm:$0xff]  ;;  %v73_v52 = vld [vmem:[#allocation5 + $0x90] sm:$0xff] }
  0x2e   :  { %456 = vmatprep.subr.mxu1 %v111_v29  ;;  %419 = vmatpush3.msra.mxu0 %v63_v30  ;;  %v106_v49 = vld [vmem:[#allocation5 + $0x198] sm:$0xff]  ;;  %v105_v53 = vld [vmem:[#allocation5 + $0x190] sm:$0xff]  ;;  %v72_v56 = vld [vmem:[#allocation5 + $0x88] sm:$0xff] }
  0x2f   :  { %457 = vmatpush3.msra.mxu1 %v95_v31  ;;  %420 = vmatprep.subr.mxu0 %v78_v32  ;;  %v58_v50 = vld [vmem:[#allocation5 + $0x18] sm:$0xff]  ;;  %v57_v54 = vld [vmem:[#allocation5 + $0x10] sm:$0xff]  ;;  %v104_v57 = vld [vmem:[#allocation5 + $0x188] sm:$0xff] }
  0x30   :  { %458 = vmatprep.subr.mxu1 %v110_v33  ;;  %421 = vmatpush3.msra.mxu0 %v62_v34  ;;  %v90_v51 = vld [vmem:[#allocation5 + $0x118] sm:$0xff]  ;;  %v89_v55 = vld [vmem:[#allocation5 + $0x110] sm:$0xff]  ;;  %v56_v58 = vld [vmem:[#allocation5 + $0x8] sm:$0xff] }
  0x31   :  { %459 = vmatpush3.msra.mxu1 %v94_v35  ;;  %422 = vmatprep.subr.mxu0 %v77_v36  ;;  %v88_v59 = vld [vmem:[#allocation5 + $0x108] sm:$0xff]  ;;  %v71_v60 = vld [vmem:[#allocation5 + $0x80] sm:$0xff]  ;;  %v46_v1 = vld [vmem:[#allocation2 + $0x18] sm:$0xff] }
  0x32   :  { %460 = vmatprep.subr.mxu1 %v109_v37  ;;  %423 = vmatpush3.msra.mxu0 %v61_v38  ;;  %v103_v61 = vld [vmem:[#allocation5 + $0x180] sm:$0xff]  ;;  %v44_v63 = vld [vmem:[#allocation2 + $0x8] sm:$0xff]  ;;  %v45_v3 = vld [vmem:[#allocation2 + $0x10] sm:$0xff] }
  0x33   :  { %461 = vmatpush3.msra.mxu1 %v93_v39  ;;  %424 = vmatprep.subr.mxu0 %v76_v40  ;;  %v55_v62 = vld [vmem:[#allocation5] sm:$0xff]  ;;  %v150_v4 = vld [vmem:[#allocation5 + $0x2f8] sm:$0xff]  ;;  %v149_v6 = vld [vmem:[#allocation5 + $0x2f0] sm:$0xff] }
  0x34   :  { %462 = vmatprep.subr.mxu1 %v108_v41  ;;  %425 = vmatpush3.msra.mxu0 %v60_v42  ;;  %v87_v0 = vld [vmem:[#allocation5 + $0x100] sm:$0xff]  ;;  %v134_v5 = vld [vmem:[#allocation5 + $0x278] sm:$0xff]  ;;  %v133_v7 = vld [vmem:[#allocation5 + $0x270] sm:$0xff] }
  0x35   :  { %463 = vmatpush3.msra.mxu1 %v92_v43  ;;  %426 = vmatprep.subr.mxu0 %v75_v44  ;;  %v43_v2 = vld [vmem:[#allocation2] sm:$0xff]  ;;  %v148_v8 = vld [vmem:[#allocation5 + $0x2e8] sm:$0xff]  ;;  %v146_v12 = vld [vmem:[#allocation5 + $0x2d8] sm:$0xff] }
  0x36   :  { %464 = vmatprep.subr.mxu1 %v107_v45  ;;  %427 = vmatpush3.msra.mxu0 %v59_v46  ;;  %v132_v9 = vld [vmem:[#allocation5 + $0x268] sm:$0xff]  ;;  %v147_v10 = vld [vmem:[#allocation5 + $0x2e0] sm:$0xff]  ;;  %v130_v13 = vld [vmem:[#allocation5 + $0x258] sm:$0xff] }
  0x37   :  { %465 = vmatpush3.msra.mxu1 %v91_v47  ;;  %428 = vmatprep.subr.mxu0 %v74_v48  ;;  %v131_v11 = vld [vmem:[#allocation5 + $0x260] sm:$0xff]  ;;  %v145_v14 = vld [vmem:[#allocation5 + $0x2d0] sm:$0xff]  ;;  %v144_v16 = vld [vmem:[#allocation5 + $0x2c8] sm:$0xff] }
  0x38   :  { %466 = vmatprep.subr.mxu1 %v106_v49  ;;  %429 = vmatpush3.msra.mxu0 %v58_v50  ;;  %v129_v15 = vld [vmem:[#allocation5 + $0x250] sm:$0xff]  ;;  %v128_v17 = vld [vmem:[#allocation5 + $0x248] sm:$0xff]  ;;  %v143_v18 = vld [vmem:[#allocation5 + $0x2c0] sm:$0xff] }
  0x39   :  { %467 = vmatpush3.msra.mxu1 %v90_v51  ;;  %430 = vmatprep.subr.mxu0 %v73_v52  ;;  %v127_v19 = vld [vmem:[#allocation5 + $0x240] sm:$0xff]  ;;  %v142_v20 = vld [vmem:[#allocation5 + $0x2b8] sm:$0xff]  ;;  %v141_v22 = vld [vmem:[#allocation5 + $0x2b0] sm:$0xff] }
  0x3a   :  { %468 = vmatprep.subr.mxu1 %v105_v53  ;;  %431 = vmatpush3.msra.mxu0 %v57_v54  ;;  %v126_v21 = vld [vmem:[#allocation5 + $0x238] sm:$0xff]  ;;  %v125_v23 = vld [vmem:[#allocation5 + $0x230] sm:$0xff]  ;;  %v140_v24 = vld [vmem:[#allocation5 + $0x2a8] sm:$0xff] }
  0x3b   :  { %469 = vmatpush3.msra.mxu1 %v89_v55  ;;  %432 = vmatprep.subr.mxu0 %v72_v56  ;;  %v124_v25 = vld [vmem:[#allocation5 + $0x228] sm:$0xff]  ;;  %v139_v26 = vld [vmem:[#allocation5 + $0x2a0] sm:$0xff]  ;;  %v50_v27 = vld [vmem:[#allocation2 + $0x38] sm:$0xff] }
  0x3c   :  { %470 = vmatprep.subr.mxu1 %v104_v57  ;;  %433 = vmatpush3.msra.mxu0 %v56_v58  ;;  %v123_v28 = vld [vmem:[#allocation5 + $0x220] sm:$0xff]  ;;  %v49_v29 = vld [vmem:[#allocation2 + $0x30] sm:$0xff]  ;;  %v138_v30 = vld [vmem:[#allocation5 + $0x298] sm:$0xff] }
  0x3d   :  { %471 = vmatpush3.msra.mxu1 %v88_v59  ;;  %434 = vmatprep.subr.mxu0 %v71_v60  ;;  %v52_v31 = vld [vmem:[#allocation2 + $0x48] sm:$0xff]  ;;  %v122_v32 = vld [vmem:[#allocation5 + $0x218] sm:$0xff]  ;;  %v137_v33 = vld [vmem:[#allocation5 + $0x290] sm:$0xff] }
  0x3e   :  { %472 = vmatprep.subr.mxu1 %v103_v61  ;;  %435 = vmatpush3.msra.mxu0 %v55_v62  ;;  %v51_v34 = vld [vmem:[#allocation2 + $0x40] sm:$0xff]  ;;  %v121_v35 = vld [vmem:[#allocation5 + $0x210] sm:$0xff]  ;;  %v136_v36 = vld [vmem:[#allocation5 + $0x288] sm:$0xff] }
  0x3f   :  { %222 = vmatprep.mubr.f32.mxu0 %v44_v63  ;;  %473 = vmatpush3.msra.mxu1 %v87_v0  ;;  %v120_v37 = vld [vmem:[#allocation5 + $0x208] sm:$0xff]  ;;  %v135_v38 = vld [vmem:[#allocation5 + $0x280] sm:$0xff]  ;;  %v54_v41 = vld [vmem:[#allocation2 + $0x58] sm:$0xff] }
  0x40   :  { %297 = vmatprep.mubr.f32.mxu1 %v46_v1  ;;  %223 = vmatmul.mubr.f32.vlgmr.msra.gmra.mxu0 %v43_v2  ;;  %v119_v39 = vld [vmem:[#allocation5 + $0x200] sm:$0xff]  ;;  %v48_v40 = vld [vmem:[#allocation2 + $0x28] sm:$0xff]  ;;  %v53_v43 = vld [vmem:[#allocation2 + $0x50] sm:$0xff] }
  0x41   :  { %298 = vmatmul.mubr.f32.vlgmr.msra.gmra.mxu1 %v45_v3  ;;  %480 = vmatprep.subr.mxu0 %v150_v4  ;;  %v47_v42 = vld [vmem:[#allocation2 + $0x20] sm:$0xff] }
  0x42   :  { %518 = vmatprep.subr.mxu1 %v150_v4  ;;  %481 = vmatpush3.msra.mxu0 %v134_v5  ;;  %v403_v53 = vld [vmem:[%s670_s2] ss:$0 sm:$0xff]  ;;  %s597_s2 = scalar_lea.vmem %s391_s27, 256 }
  0x43   :  { %534 = vmatpush3.msra.mxu1 %v134_v5  ;;  %482 = vmatprep.subr.mxu0 %v149_v6  ;;  %p598_p10 = scmp.ne.s32.totalorder %s391_s27, %s597_s2  ;;  %p603_p12 = scmp.lt.s32.totalorder %s597_s2, %s597_s2 }
  0x44   :  { %519 = vmatprep.subr.mxu1 %v149_v6  ;;  %483 = vmatpush3.msra.mxu0 %v133_v7 }
  0x45   :  { %535 = vmatpush3.msra.mxu1 %v133_v7  ;;  %484 = vmatprep.subr.mxu0 %v148_v8  ;;  %p604_p13 = por %p603_p12, %p602_p11 }
  0x46   :  { %520 = vmatprep.subr.mxu1 %v148_v8  ;;  %485 = vmatpush3.msra.mxu0 %v132_v9 }
  0x47   :  { %536 = vmatpush3.msra.mxu1 %v132_v9  ;;  %486 = vmatprep.subr.mxu0 %v147_v10  ;;  %p605_p0 = pnand %p604_p13, %p598_p10 }
  0x48   :  { %521 = vmatprep.subr.mxu1 %v147_v10  ;;  %487 = vmatpush3.msra.mxu0 %v131_v11 }
  0x49   :  { %537 = vmatpush3.msra.mxu1 %v131_v11  ;;  %488 = vmatprep.subr.mxu0 %v146_v12 }
  0x4a   :  { %522 = vmatprep.subr.mxu1 %v146_v12  ;;  %489 = vmatpush3.msra.mxu0 %v130_v13 }
  0x4b   :  { %538 = vmatpush3.msra.mxu1 %v130_v13  ;;  %490 = vmatprep.subr.mxu0 %v145_v14 }
  0x4c   :  { %523 = vmatprep.subr.mxu1 %v145_v14  ;;  %491 = vmatpush3.msra.mxu0 %v129_v15 }
  0x4d   :  { %539 = vmatpush3.msra.mxu1 %v129_v15  ;;  %492 = vmatprep.subr.mxu0 %v144_v16 }
  0x4e   :  { %524 = vmatprep.subr.mxu1 %v144_v16  ;;  %493 = vmatpush3.msra.mxu0 %v128_v17 }
  0x4f   :  { %540 = vmatpush3.msra.mxu1 %v128_v17  ;;  %494 = vmatprep.subr.mxu0 %v143_v18 }
  0x50   :  { %525 = vmatprep.subr.mxu1 %v143_v18  ;;  %495 = vmatpush3.msra.mxu0 %v127_v19 }
  0x51   :  { %541 = vmatpush3.msra.mxu1 %v127_v19  ;;  %496 = vmatprep.subr.mxu0 %v142_v20 }
  0x52   :  { %526 = vmatprep.subr.mxu1 %v142_v20  ;;  %497 = vmatpush3.msra.mxu0 %v126_v21 }
  0x53   :  { %542 = vmatpush3.msra.mxu1 %v126_v21  ;;  %498 = vmatprep.subr.mxu0 %v141_v22 }
  0x54   :  { %527 = vmatprep.subr.mxu1 %v141_v22  ;;  %499 = vmatpush3.msra.mxu0 %v125_v23 }
  0x55   :  { %543 = vmatpush3.msra.mxu1 %v125_v23  ;;  %500 = vmatprep.subr.mxu0 %v140_v24 }
  0x56   :  { %528 = vmatprep.subr.mxu1 %v140_v24  ;;  %501 = vmatpush3.msra.mxu0 %v124_v25 }
  0x57   :  { %544 = vmatpush3.msra.mxu1 %v124_v25  ;;  %502 = vmatprep.subr.mxu0 %v139_v26 }
  0x58   :  { %529 = vmatprep.subr.mxu1 %v139_v26  ;;  %227 = vmatprep.mubr.f32.mxu0 %v50_v27 }
  0x59   :  { %503 = vmatpush3.msra.mxu0 %v123_v28  ;;  %545 = vmatpush3.msra.mxu1 %v123_v28 }
  0x5a   :  { %228 = vmatmul.mubr.f32.gmra.mxu0 %v49_v29  ;;  %504 = vmatprep.subr.mxu0 %v138_v30 }
  0x5b   :  { %530 = vmatprep.subr.mxu1 %v138_v30  ;;  %302 = vmatprep.mubr.f32.mxu1 %v52_v31 }
  0x5c   :  { %505 = vmatpush3.msra.mxu0 %v122_v32  ;;  %546 = vmatpush3.msra.mxu1 %v122_v32 }
  0x5d   :  { %506 = vmatprep.subr.mxu0 %v137_v33  ;;  %303 = vmatmul.mubr.f32.gmra.mxu1 %v51_v34 }
  0x5e   :  { %531 = vmatprep.subr.mxu1 %v137_v33  ;;  %507 = vmatpush3.msra.mxu0 %v121_v35 }
  0x5f   :  { %547 = vmatpush3.msra.mxu1 %v121_v35  ;;  %508 = vmatprep.subr.mxu0 %v136_v36 }
  0x60   :  { %532 = vmatprep.subr.mxu1 %v136_v36  ;;  %509 = vmatpush3.msra.mxu0 %v120_v37 }
  0x61   :  { %548 = vmatpush3.msra.mxu1 %v120_v37  ;;  %510 = vmatprep.subr.mxu0 %v135_v38 }
  0x62   :  { %533 = vmatprep.subr.mxu1 %v135_v38  ;;  %511 = vmatpush3.msra.mxu0 %v119_v39 }
  0x63   :  { %549 = vmatpush3.msra.mxu1 %v119_v39  ;;  %372 = vmatprep.mubr.f32.mxu0 %v48_v40 }
  0x64   :  { %377 = vmatprep.mubr.f32.mxu1 %v54_v41  ;;  %373 = vmatmul.mubr.f32.vlgmr.msra.gmra.mxu0 %v47_v42 }
  0x65   :  { %378 = vmatmul.mubr.f32.vlgmr.msra.gmra.mxu1 %v53_v43 }
 0x100   :  { %v436_v44 = vpop.f32.mrf.mxu0 }
 0x101   :  { %v474_v45 = vpop.f32.mrf.mxu1 }
 0x102   :  { %v437_v46 = vpop.f32.mrf.mxu0 }
 0x103   :  { %v475_v48 = vpop.f32.mrf.mxu1  ;;  %v438_v51 = vadd.f32 %v437_v46, %v436_v44 }
 0x104   :  { %v476_v60 = vadd.f32 %v475_v48, %v474_v45 }
 0x105   :  { %v225_v55 = vadd.f32 %v438_v51, %v403_v53 }
 0x107   :  { %v300_v63 = vadd.f32 %v476_v60, %v225_v55 }
 0x11a   :  { %v439_v47 = vpop.f32.mrf.mxu0 }
 0x11c   :  { %v440_v49 = vpop.f32.mrf.mxu0 }
 0x11d   :  { %v477_v50 = vpop.f32.mrf.mxu1  ;;  %v441_v52 = vadd.f32 %v440_v49, %v439_v47 }
 0x11f   :  { %v478_v54 = vpop.f32.mrf.mxu1  ;;  %v230_v56 = vadd.f32 %v441_v52, %v403_v53 }
 0x120   :  { %v479_v57 = vadd.f32 %v478_v54, %v477_v50 }
 0x122   :  { %v305_v0 = vadd.f32 %v479_v57, %v230_v56 }
 0x124   :  { %v512_v58 = vpop.f32.mrf.mxu0 }
 0x125   :  { %v515_v59 = vpop.f32.mrf.mxu1 }
 0x126   :  { %v513_v61 = vpop.f32.mrf.mxu0 }
 0x127   :  { %v516_v62 = vpop.f32.mrf.mxu1  ;;  %v514_v1 = vadd.f32 %v513_v61, %v512_v58 }
 0x128   :  { %v517_v2 = vadd.f32 %v516_v62, %v515_v59 }
 0x129   :  { %v375_v3 = vadd.f32 %v514_v1, %v300_v63 }
 0x12a   :  { %v380_v4 = vadd.f32 %v517_v2, %v305_v0 }
 0x12b   :  { %383 = vst [vmem:[#allocation7] sm:$0xff] %v375_v3 }
 0x12c   :  { %384 = vst [vmem:[#allocation7 + $0x8] sm:$0xff] %v380_v4 }
 0x12d   :  { %608 = shalt.err (!%p605_p0)
}
 0x12e   :  { %396 = dma.vmem_to_hbm [thread:$0]  %s391_s27, 256, %s671_s3, [#allocation4], %s627_s22, %s627_s22, %s628_s23  }
 0x12f   :  { %621 = dma.done.wait [#allocation4], 256  }
 0x130   :  { %622 = vsyncadd [#allocation4], 4294967040 }
 0x131   :  { %400 = vsyncpa [#allocation3], 1 }
 0x132   :  { %401 = vsyncpa [#allocation6], 1 }
 0x133   :  { %402 = vsyncpa [#allocation4], 1 }

</bundles_post_ra>
